<compile_context>
chip_gen: v7x
topology: tpu7x:2x2x1
jax: 0.10.0
libtpu: 0.0.40
codegen_flags: <defaults>
</compile_context>

<pallas_src>
import functools

import jax
import jax.numpy as jnp
from jax.experimental import pallas as pl
from jax.experimental.pallas import tpu as pltpu

LANES = 128
SUBLANES = 8


def _round_up(x, m):
    return ((x + m - 1) // m) * m


def _focal_term(u, gamma):
    # (1 - pt) ** gamma, specialised for small integer gamma: a float-exponent
    # pow lowers to exp(gamma * log(u)) -> 2 EUP transcendentals per element.
    if gamma == 0.0:
        return jnp.ones_like(u)
    if gamma == 1.0:
        return u
    if gamma == 2.0:
        return u * u
    if gamma == 3.0:
        return u * u * u
    # General (possibly non-integer) gamma: clamp so that 1-pt rounding
    # slightly negative with soft targets cannot produce NaN.
    return jnp.maximum(u, 0.0) ** gamma


def _focal_sum_kernel(x_ref, t_ref, out_ref, *, alpha, gamma, rows_total,
                      tile_rows, inner_blocks, needs_mask):
    """Accumulate per-core partial focal-loss sums into a (1, 128) block."""
    c = pl.program_id(0)          # "parallel" (core) axis
    i = pl.program_id(1)          # "arbitrary" (reduction) axis

    @pl.when(i == 0)
    def _():
        out_ref[...] = jnp.zeros_like(out_ref)

    x = x_ref[...].astype(jnp.float32)
    t = t_ref[...].astype(jnp.float32)

    # Numerically-stable BCE-with-logits (matches torch's
    # binary_cross_entropy_with_logits):
    #   bce = max(x, 0) - x*t + log(1 + exp(-|x|))
    e = jnp.exp(-jnp.abs(x))                       # exp(-|x|) in (0, 1]
    bce = jnp.maximum(x, 0.0) - x * t + jnp.log1p(e)

    # sigmoid(x), reusing e:  1/(1+e) if x >= 0 else e/(1+e).  pl.reciprocal
    # keeps the divide on the EUP; approx=True would also be fine (the kernel
    # is HBM-bound either way) but exact keeps parity with the f32 reference.
    r = pl.reciprocal(1.0 + e)
    p = jnp.where(x >= 0.0, 1.0, e) * r

    pt = p * t + (1.0 - p) * (1.0 - t)
    focal = alpha * (_focal_term(1.0 - pt, gamma) * bce)

    if needs_mask:
        row = jax.lax.broadcasted_iota(jnp.int32, focal.shape, 0)
        global_row = (c * inner_blocks + i) * tile_rows + row
        focal = jnp.where(global_row < rows_total, focal, 0.0)

    # Reduce only along sublanes per tile (VPU adds + one sublane reduce);
    # the single cross-lane reduce to a scalar happens once, in the wrapper.
    out_ref[...] += jnp.sum(focal, axis=0, keepdims=True)


def _focal_elems_jnp(x, t, alpha, gamma):
    """Plain-JAX elementwise focal loss (ragged tail + reference check)."""
    x = x.astype(jnp.float32)
    t = t.astype(jnp.float32)
    bce = jnp.maximum(x, 0.0) - x * t + jnp.log1p(jnp.exp(-jnp.abs(x)))
    p = jax.nn.sigmoid(x)
    pt = p * t + (1.0 - p) * (1.0 - t)
    return alpha * (1.0 - pt) ** gamma * bce


def focal_loss(logits, targets, alpha=0.25, gamma=2.0, reduction='mean'):
    """Focal loss over (N, C, H, W) logits/targets.  reduction: 'mean'|'sum'."""
    assert logits.shape == targets.shape
    if reduction not in ('none', 'mean', 'sum'):
        raise ValueError(f"Invalid reduction mode: {reduction}")
    if reduction == 'none':
        # TODO(synk): 'none' reduction (elementwise NCHW output) is not wired
        # through this sum-reduction kernel; it would need a separate
        # elementwise kernel.
        raise NotImplementedError("reduction='none' not implemented in kernel")

    alpha = float(alpha)
    gamma = float(gamma)
    n = logits.size

    flat_x = logits.reshape(-1)
    flat_t = targets.reshape(-1)

    n_main = (n // LANES) * LANES      # lane-aligned prefix handled in-kernel
    rows = n_main // LANES

    total = jnp.zeros((), jnp.float32)

    if rows > 0:
        if n_main == n:                # reshape of contiguous input is free
            x2 = flat_x.reshape(rows, LANES)
            t2 = flat_t.reshape(rows, LANES)
        else:
            x2 = flat_x[:n_main].reshape(rows, LANES)
            t2 = flat_t[:n_main].reshape(rows, LANES)

        tile_rows = min(2048, _round_up(rows, SUBLANES))
        nb = pl.cdiv(rows, tile_rows)          # number of valid row-blocks
        ncores = 2 if nb >= 2 else 1           # shard reduction for v7x's 2 TCs
        inner = pl.cdiv(nb, ncores)
        needs_mask = (nb * tile_rows != rows) or (ncores * inner != nb)

        def in_map(c, i):
            b = c * inner + i
            if ncores * inner != nb:           # odd block count: clamp; the
                b = jnp.minimum(b, nb - 1)     # extra step is fully masked out
            return (b, 0)

        kernel = functools.partial(
            _focal_sum_kernel, alpha=alpha, gamma=gamma, rows_total=rows,
            tile_rows=tile_rows, inner_blocks=inner, needs_mask=needs_mask)

        in_bytes = (x2.dtype.itemsize + t2.dtype.itemsize) * n_main
        cost = pl.CostEstimate(flops=15 * n_main,
                               transcendentals=3 * n_main,
                               bytes_accessed=in_bytes + ncores * LANES * 4)

        partials = pl.pallas_call(
            kernel,
            out_shape=jax.ShapeDtypeStruct((1, ncores * LANES), jnp.float32),
            grid_spec=pltpu.PrefetchScalarGridSpec(
                num_scalar_prefetch=0,
                grid=(ncores, inner),
                in_specs=[
                    pl.BlockSpec((tile_rows, LANES), in_map),
                    pl.BlockSpec((tile_rows, LANES), in_map),
                ],
                out_specs=pl.BlockSpec((1, LANES), lambda c, i: (0, c)),
            ),
            compiler_params=pltpu.CompilerParams(
                dimension_semantics=("parallel", "arbitrary")),
            cost_estimate=cost,
        )(x2, t2)
        total = total + jnp.sum(partials)

    if n_main < n:
        # Ragged tail (< 128 elements): negligible, plain jnp in the wrapper.
        total = total + jnp.sum(
            _focal_elems_jnp(flat_x[n_main:], flat_t[n_main:], alpha, gamma))

    if reduction == 'sum':
        return total
    return total / jnp.float32(n)


if __name__ == "__main__":
    key = jax.random.PRNGKey(0)
    k1, k2 = jax.random.split(key)
    N, C, H, W = 2, 4, 16, 16
    logits = jax.random.normal(k1, (N, C, H, W), dtype=jnp.float32)
    targets = (jax.random.uniform(k2, (N, C, H, W)) > 0.5).astype(jnp.float32)

    out = focal_loss(logits, targets, alpha=0.25, gamma=2.0, reduction='mean')
    out = jax.block_until_ready(out)

    ref = jnp.mean(_focal_elems_jnp(logits, targets, 0.25, 2.0))
    assert jnp.allclose(out, ref, rtol=1e-5, atol=1e-6), (out, ref)
    print("KERNEL_OK")
</pallas_src>

<mosaic_0001>
module attributes {stable_mosaic.version = 11 : i64} {
  func.func @_focal_sum_kernel(%arg0: i32, %arg1: i32, %arg2: memref<16x128xf32, #tpu.memory_space<vmem>>, %arg3: memref<16x128xf32, #tpu.memory_space<vmem>>, %arg4: memref<1x128xf32, #tpu.memory_space<vmem>>) attributes {dimension_semantics = [#tpu.dimension_semantics<parallel>, #tpu.dimension_semantics<arbitrary>], iteration_bounds = array<i64: 1, 1>, scalar_prefetch = 0 : i64, scratch_operands = 0 : i64, tpu.core_type = #tpu.core_type<tc>, window_params = [{transform_indices = @transform_0, window_bounds = array<i64: 16, 128>}, {transform_indices = @transform_1, window_bounds = array<i64: 16, 128>}, {transform_indices = @transform_2, window_bounds = array<i64: 1, 128>}]} {
    %c0_i32 = arith.constant 0 : i32
    %0 = arith.cmpi eq, %arg1, %c0_i32 : i32
    %1 = arith.extui %0 : i1 to i32
    %c0_i32_0 = arith.constant 0 : i32
    %2 = arith.cmpi ne, %1, %c0_i32_0 : i32
    scf.if %2 {
      %cst_17 = arith.constant 0.000000e+00 : f32
      %41 = vector.broadcast %cst_17 : f32 to vector<1x128xf32>
      %c0_18 = arith.constant 0 : index
      %c0_19 = arith.constant 0 : index
      %42 = vector.load %arg4[%c0_18, %c0_19] : memref<1x128xf32, #tpu.memory_space<vmem>>, vector<1x128xf32>
      tpu.vector_store %arg4[%c0_18, %c0_19], %41 {strides = array<i32>} : memref<1x128xf32, #tpu.memory_space<vmem>>, vector<1x128xf32>,
    } else {
    }
    %c0 = arith.constant 0 : index
    %c0_1 = arith.constant 0 : index
    %3 = vector.load %arg2[%c0, %c0_1] : memref<16x128xf32, #tpu.memory_space<vmem>>, vector<16x128xf32>
    %c0_2 = arith.constant 0 : index
    %c0_3 = arith.constant 0 : index
    %4 = vector.load %arg3[%c0_2, %c0_3] : memref<16x128xf32, #tpu.memory_space<vmem>>, vector<16x128xf32>
    %5 = math.absf %3 : vector<16x128xf32>
    %cst = arith.constant 0.000000e+00 : f32
    %6 = vector.broadcast %cst : f32 to vector<16x128xf32>
    %7 = arith.subf %6, %5 : vector<16x128xf32>
    %8 = math.exp %7 : vector<16x128xf32>
    %cst_4 = arith.constant 0.000000e+00 : f32
    %9 = vector.broadcast %cst_4 : f32 to vector<16x128xf32>
    %10 = arith.maximumf %3, %9 : vector<16x128xf32>
    %11 = arith.mulf %3, %4 : vector<16x128xf32>
    %12 = arith.subf %10, %11 : vector<16x128xf32>
    %13 = math.log1p %8 : vector<16x128xf32>
    %14 = arith.addf %12, %13 : vector<16x128xf32>
    %cst_5 = arith.constant 1.000000e+00 : f32
    %15 = vector.broadcast %cst_5 : f32 to vector<16x128xf32>
    %16 = arith.addf %15, %8 : vector<16x128xf32>
    %17 = tpu.reciprocal %16 : vector<16x128xf32> -> vector<16x128xf32>
    %cst_6 = arith.constant 0.000000e+00 : f32
    %18 = vector.broadcast %cst_6 : f32 to vector<16x128xf32>
    %19 = arith.cmpf oge, %3, %18 : vector<16x128xf32>
    %cst_7 = arith.constant 1.000000e+00 : f32
    %20 = vector.broadcast %cst_7 : f32 to vector<16x128xf32>
    %21 = arith.select %19, %20, %8 : vector<16x128xi1>, vector<16x128xf32>
    %22 = arith.mulf %21, %17 : vector<16x128xf32>
    %23 = arith.mulf %22, %4 : vector<16x128xf32>
    %cst_8 = arith.constant 1.000000e+00 : f32
    %24 = vector.broadcast %cst_8 : f32 to vector<16x128xf32>
    %25 = arith.subf %24, %22 : vector<16x128xf32>
    %cst_9 = arith.constant 1.000000e+00 : f32
    %26 = vector.broadcast %cst_9 : f32 to vector<16x128xf32>
    %27 = arith.subf %26, %4 : vector<16x128xf32>
    %28 = arith.mulf %25, %27 : vector<16x128xf32>
    %29 = arith.addf %23, %28 : vector<16x128xf32>
    %cst_10 = arith.constant 1.000000e+00 : f32
    %30 = vector.broadcast %cst_10 : f32 to vector<16x128xf32>
    %31 = arith.subf %30, %29 : vector<16x128xf32>
    %32 = arith.mulf %31, %31 : vector<16x128xf32>
    %33 = arith.mulf %32, %14 : vector<16x128xf32>
    %cst_11 = arith.constant 2.500000e-01 : f32
    %34 = vector.broadcast %cst_11 : f32 to vector<16x128xf32>
    %35 = arith.mulf %34, %33 : vector<16x128xf32>
    %c0_12 = arith.constant 0 : index
    %c0_13 = arith.constant 0 : index
    %36 = vector.load %arg4[%c0_12, %c0_13] : memref<1x128xf32, #tpu.memory_space<vmem>>, vector<1x128xf32>
    %cst_14 = arith.constant dense<0.000000e+00> : vector<128xf32>
    %37 = vector.multi_reduction <add>, %35, %cst_14 [0] : vector<16x128xf32> to vector<128xf32>
    %38 = vector.shape_cast %37 : vector<128xf32> to vector<1x128xf32>
    %39 = arith.addf %36, %38 : vector<1x128xf32>
    %c0_15 = arith.constant 0 : index
    %c0_16 = arith.constant 0 : index
    %40 = vector.load %arg4[%c0_15, %c0_16] : memref<1x128xf32, #tpu.memory_space<vmem>>, vector<1x128xf32>
    tpu.vector_store %arg4[%c0_15, %c0_16], %39 {strides = array<i32>} : memref<1x128xf32, #tpu.memory_space<vmem>>, vector<1x128xf32>,
    return
  }
  func.func @transform_0(%arg0: i32, %arg1: i32) -> (i32, i32) {
    %c1_i32 = arith.constant 1 : i32
    %0 = arith.muli %arg0, %c1_i32 : i32
    %1 = arith.addi %0, %arg1 : i32
    %c0_i32 = arith.constant 0 : i32
    %c0_i32_0 = arith.constant 0 : i32
    return %1, %c0_i32 : i32, i32
  }
  func.func @transform_1(%arg0: i32, %arg1: i32) -> (i32, i32) {
    %c1_i32 = arith.constant 1 : i32
    %0 = arith.muli %arg0, %c1_i32 : i32
    %1 = arith.addi %0, %arg1 : i32
    %c0_i32 = arith.constant 0 : i32
    %c0_i32_0 = arith.constant 0 : i32
    return %1, %c0_i32 : i32, i32
  }
  func.func @transform_2(%arg0: i32, %arg1: i32) -> (i32, i32) {
    %c0_i32 = arith.constant 0 : i32
    %c0_i32_0 = arith.constant 0 : i32
    return %c0_i32, %arg0 : i32, i32
  }
}

</mosaic_0001>

<bundles_post_ra>
// kernel: tpu_custom_call.1
= control target key start
LH: loop header
LB: loop body
LE: loop exit
PB: predicated region body
PF: predicated region fallthrough
CT: control target
= control target key end

     0   :  { %7 = vsyncpa [#allocation3], 0  ;;  %s302_s0 = inlined_call_operand.hbm [shape: f32[16,128], index: 0, kind: input, shape index: {}]   ;;  %s303_s1 = inlined_call_operand.hbm [shape: f32[16,128], index: 1, kind: input, shape index: {}]   ;;  %s304_s2 = inlined_call_operand.hbm [shape: f32[1,128], index: 2, kind: output, shape index: {}]  }
   0x1   :  { %8 = vsyncpa [#allocation6], 0 }
   0x2   :  { %9 = vsyncpa [#allocation4], 0  ;;  %s239_s9 = smov [#allocation2]   ;;  %s167_s13 = scalar_lea.hbm %s302_s0, 256 }
   0x3   :  { %s19_s10 = sshll.u32 %s239_s9, 4  ;;  %p168_p0 = scmp.ne.s32.totalorder %s302_s0, %s167_s13  ;;  %s20_s10 = int_to_ptr.vmem [resolvable:$true] %s19_s10 }
   0x4   :  { %p171_p1 = scmp.lt.u32.totalorder %s167_s13, %s302_s0 }
   0x6   :  { %p173_p2 = pnand %p171_p1, %p168_p0 }
   0x8   :  { %176 = shalt.err (!%p173_p2)
}
   0x9   :  { %s177_s18 = scalar_lea.vmem %s20_s10, 256  ;;  %p182_p4 = scmp.lt.s32.totalorder %s20_s10, %s20_s10 }
   0xa   :  { %p178_p3 = scmp.ne.s32.totalorder %s20_s10, %s177_s18  ;;  %p183_p5 = scmp.lt.s32.totalorder %s177_s18, %s177_s18 }
   0xc   :  { %p184_p6 = por %p183_p5, %p182_p4 }
   0xe   :  { %p185_p7 = pnand %p184_p6, %p178_p3 }
  0x10   :  { %188 = shalt.err (!%p185_p7)
}
  0x11   :  { %s240_s19 = smov 128   ;;  %s241_s20 = smov 8  }
  0x12   :  { %25 = dma.hbm_to_vmem [thread:$0]  %s302_s0, 256, %s20_s10, [#allocation3], %s240_s19, %s240_s19, %s241_s20  }
  0x13   :  { %s242_s23 = smov [#allocation5]   ;;  %s189_s27 = scalar_lea.hbm %s303_s1, 256 }
  0x14   :  { %s35_s24 = sshll.u32 %s242_s23, 4  ;;  %p190_p8 = scmp.ne.s32.totalorder %s303_s1, %s189_s27  ;;  %s36_s24 = int_to_ptr.vmem [resolvable:$true] %s35_s24 }
  0x15   :  { %p193_p9 = scmp.lt.u32.totalorder %s189_s27, %s303_s1 }
  0x17   :  { %p195_p10 = pnand %p193_p9, %p190_p8 }
  0x19   :  { %198 = shalt.err (!%p195_p10)
}
  0x1a   :  { %s199_s4 = scalar_lea.vmem %s36_s24, 256  ;;  %p204_p12 = scmp.lt.s32.totalorder %s36_s24, %s36_s24 }
  0x1b   :  { %p200_p11 = scmp.ne.s32.totalorder %s36_s24, %s199_s4  ;;  %p205_p13 = scmp.lt.s32.totalorder %s199_s4, %s199_s4 }
  0x1d   :  { %p206_p0 = por %p205_p13, %p204_p12 }
  0x1f   :  { %p207_p1 = pnand %p206_p0, %p200_p11 }
  0x21   :  { %210 = shalt.err (!%p207_p1)
}
  0x22   :  { %41 = dma.hbm_to_vmem [thread:$0]  %s303_s1, 256, %s36_s24, [#allocation6], %s240_s19, %s240_s19, %s241_s20  }
  0x23   :  { %233 = dma.done.wait [#allocation3], 256  }
  0x24   :  { %234 = vsyncadd [#allocation3], 4294967040 }
  0x25   :  { %235 = dma.done.wait [#allocation6], 256  }
  0x26   :  { %236 = vsyncadd [#allocation6], 4294967040  ;;  %v243_v0 = vmov 0.0   ;;  %v57_v1 = vld [vmem:[#allocation2] sm:$0xff]  ;;  %v58_v2 = vld [vmem:[#allocation2 + $0x8] sm:$0xff]  ;;  %s244_s1 = smov [#allocation7]  }
  0x27   :  { %56 = vst [vmem:[#allocation7] sm:$0x1] %v243_v0  ;;  %v61_v3 = vand.u32 2147483647, %v57_v1  ;;  %v62_v4 = vand.u32 2147483647, %v58_v2 }
  0x28   :  { %vm99_vm0 = vcmp.ge.f32.partialorder %v57_v1, 0.0  ;;  %vm100_vm1 = vcmp.ge.f32.partialorder %v58_v2, 0.0  ;;  %v59_v16 = vld [vmem:[#allocation5] sm:$0xff]  ;;  %v60_v17 = vld [vmem:[#allocation5 + $0x8] sm:$0xff]  ;;  %v69_v25 = vmax.f32 %v57_v1, 0.0  ;;  %v70_v26 = vmax.f32 %v58_v2, 0.0 }
  0x29   :  { %v63_v5 = vsub.f32 0.0, %v61_v3  ;;  %v64_v6 = vsub.f32 0.0, %v62_v4  ;;  %v71_v27 = vmul.f32 %v59_v16, %v57_v1  ;;  %v72_v30 = vmul.f32 %v60_v17, %v58_v2  ;;  %s139_s6 = sshll.u32 %s244_s1, 4  ;;  %s140_s6 = int_to_ptr.vmem [resolvable:$true] %s139_s6 }
  0x2a   :  { %v109_v32 = vsub.f32 1.0, %v59_v16  ;;  %v110_v33 = vsub.f32 1.0, %v60_v17  ;;  %s211_s7 = scalar_lea.vmem %s140_s6, 16  ;;  %s215_s8 = scalar_lea.vmem %s140_s6, 32 }
  0x2b   :  { %v65_v7 = vmul.f32 1.442695, %v63_v5  ;;  %v67_v8 = vmul.f32 1.442695, %v64_v6  ;;  %v73_v44 = vsub.f32 %v69_v25, %v71_v27  ;;  %v74_v46 = vsub.f32 %v70_v26, %v72_v30  ;;  %p212_p2 = scmp.ne.s32.totalorder %s140_s6, %s211_s7  ;;  %p216_p3 = scmp.lt.s32.totalorder %s140_s6, %s140_s6 }
  0x2c   :  { %p217_p4 = scmp.lt.s32.totalorder %s215_s8, %s211_s7 }
  0x2d   :  { %155 = vpow2.f32 %v65_v7 }
  0x2e   :  { %157 = vpow2.f32 %v67_v8  ;;  %v123_v4 = vld [vmem:[#allocation7] sm:$0x1]  ;;  %p218_p5 = por %p217_p4, %p216_p3 }
  0x30   :  { %p219_p6 = pnand %p218_p5, %p212_p2 }
  0x37   :  { %v156_v9 = vpop.eup %155 }
  0x38   :  { %v158_v10 = vpop.eup %157  ;;  %v75_v11 = vadd.f32 1.0, %v156_v9  ;;  %v78_v13 = vmul.f32 -0.5, %v156_v9  ;;  %v81_v19 = vand.u32 2147483647, %v156_v9  ;;  %v101_v20 = vsel %vm99_vm0, 1.0, %v156_v9 }
  0x39   :  { %v84_v12 = vadd.f32 1.0, %v158_v10  ;;  %v87_v14 = vmul.f32 -0.5, %v158_v10  ;;  %v102_v23 = vsel %vm100_vm1, 1.0, %v158_v10  ;;  %v90_v28 = vand.u32 2147483647, %v158_v10 }
  0x3a   :  { %159 = vlog2.f32 %v75_v11  ;;  %v79_v18 = vadd.f32 1.0, %v78_v13  ;;  %vm284_vm2 = vcmp.lt.f32.partialorder %v81_v19, 0.0004427343 }
  0x3b   :  { %161 = vlog2.f32 %v84_v12  ;;  %v88_v22 = vadd.f32 1.0, %v87_v14  ;;  %vm91_vm3 = vcmp.lt.f32.partialorder %v90_v28, 0.0004427343 }
  0x3c   :  { %163 = vrcp.f32 %v75_v11  ;;  %v80_v35 = vmul.f32 %v156_v9, %v79_v18 }
  0x3d   :  { %165 = vrcp.f32 %v84_v12  ;;  %v89_v39 = vmul.f32 %v158_v10, %v88_v22 }
  0x44   :  { %v160_v15 = vpop.eup %159 }
  0x45   :  { %v162_v21 = vpop.eup %161  ;;  %v77_v34 = vmul.f32 0.6931472, %v160_v15 }
  0x46   :  { %v164_v24 = vpop.eup %163  ;;  %v86_v38 = vmul.f32 0.6931472, %v162_v21 }
  0x47   :  { %v166_v29 = vpop.eup %165  ;;  %v103_v31 = vmul.f32 %v164_v24, %v101_v20  ;;  %v83_v47 = vsel %vm284_vm2, %v80_v35, %v77_v34 }
  0x48   :  { %v104_v37 = vmul.f32 %v166_v29, %v102_v23  ;;  %v92_v49 = vsel %vm91_vm3, %v89_v39, %v86_v38  ;;  %v93_v52 = vadd.f32 %v83_v47, %v73_v44 }
  0x49   :  { %v105_v40 = vmul.f32 %v103_v31, %v59_v16  ;;  %v107_v41 = vsub.f32 1.0, %v103_v31  ;;  %v94_v54 = vadd.f32 %v92_v49, %v74_v46 }
  0x4a   :  { %v106_v42 = vmul.f32 %v104_v37, %v60_v17  ;;  %v108_v43 = vsub.f32 1.0, %v104_v37 }
  0x4b   :  { %v111_v45 = vmul.f32 %v109_v32, %v107_v41 }
  0x4c   :  { %v112_v48 = vmul.f32 %v110_v33, %v108_v43 }
  0x4d   :  { %v113_v50 = vadd.f32 %v111_v45, %v105_v40 }
  0x4e   :  { %v114_v51 = vadd.f32 %v112_v48, %v106_v42 }
  0x4f   :  { %v115_v53 = vsub.f32 1.0, %v113_v50 }
  0x50   :  { %v116_v55 = vsub.f32 1.0, %v114_v51 }
  0x51   :  { %v117_v56 = vmul.f32 %v115_v53, %v115_v53 }
  0x52   :  { %v118_v57 = vmul.f32 %v116_v55, %v116_v55 }
  0x53   :  { %v119_v58 = vmul.f32 %v117_v56, %v93_v52 }
  0x54   :  { %v120_v59 = vmul.f32 %v118_v57, %v94_v54 }
  0x55   :  { %v121_v60 = vmul.f32 0.25, %v119_v58 }
  0x56   :  { %v122_v61 = vmul.f32 0.25, %v120_v59 }
  0x58   :  { %v124_v62 = vadd.f32 %v122_v61, %v121_v60 }
  0x5a   :  { %v125_v63 = vrot.slane %v124_v62, 4 }
  0x5c   :  { %v126_v0 = vadd.f32 %v125_v63, %v124_v62 }
  0x5e   :  { %v127_v1 = vrot.slane %v126_v0, 2 }
  0x60   :  { %v128_v2 = vadd.f32 %v127_v1, %v126_v0 }
  0x62   :  { %v129_v3 = vrot.slane %v128_v2, 1 }
  0x64   :  { %v130_v5 = vadd.f32 %v129_v3, %v128_v2 }
  0x66   :  { %v131_v6 = vadd.f32 %v130_v5, %v123_v4 }
  0x68   :  { %132 = vst [vmem:[#allocation7] sm:$0x1] %v131_v6 }
  0x69   :  { %222 = shalt.err (!%p219_p6)
}
  0x6a   :  { %s223_s11 = scalar_lea.hbm %s304_s2, 16 }
  0x6b   :  { %p224_p7 = scmp.ne.s32.totalorder %s304_s2, %s223_s11  ;;  %p227_p8 = scmp.lt.u32.totalorder %s223_s11, %s304_s2 }
  0x6d   :  { %p229_p9 = pnand %p227_p8, %p224_p7 }
  0x6f   :  { %232 = shalt.err (!%p229_p9)
}
  0x70   :  { %142 = dma.vmem_to_hbm [thread:$0]  %s140_s6, 16, %s304_s2, [#allocation4]  }
  0x71   :  { %237 = dma.done.wait [#allocation4], 16  }
  0x72   :  { %238 = vsyncadd [#allocation4], 4294967280 }
  0x73   :  { %146 = vsyncpa [#allocation3], 1 }
  0x74   :  { %147 = vsyncpa [#allocation6], 1 }
  0x75   :  { %148 = vsyncpa [#allocation4], 1 }

</bundles_post_ra>
